<compile_context>
chip_gen: v6e
topology: v6e:2x2x1
jax: 0.10.0
libtpu: 0.0.40
codegen_flags: <defaults>
</compile_context>

<pallas_src>
import functools

import jax
import jax.numpy as jnp
from jax.experimental import pallas as pl
from jax.experimental.pallas import tpu as pltpu


def _round_up(x, m):
    return (x + m - 1) // m * m


def _vmem_capacity_bytes():
    """Per-core VMEM capacity; falls back to 64 MiB if the query fails."""
    try:
        return int(pltpu.get_tpu_info().vmem_capacity_bytes)
    except Exception:
        return 64 * 2**20


def mtl_head_kernel(h_ref, ws_ref, bs_ref, w1_ref, b1_ref, w2_ref, b2_ref,
                    emb_ref, slab_ref, acc_ref, *, inv_s):
    """Chunked mean-pool over sequence + shared linear/tanh + fused heads."""
    s = pl.program_id(1)

    @pl.when(s == 0)
    def _():
        acc_ref[...] = jnp.zeros_like(acc_ref)

    # Accumulate the partial sequence sum for this chunk directly in f32
    # (fused accumulate; avoids materializing a [TB, TS, D] f32 temporary).
    acc_ref[...] += jnp.sum(h_ref[...], axis=1, dtype=jnp.float32)

    @pl.when(s == pl.num_programs(1) - 1)
    def _():
        pooled = acc_ref[...] * inv_s                                # [TB, D] f32

        # Shared Linear(D, D) + tanh.  bf16 operands on the MXU, f32 accumulate.
        emb = jnp.tanh(
            jnp.dot(pooled.astype(jnp.bfloat16), ws_ref[...],
                    preferred_element_type=jnp.float32)
            + bs_ref[...])                                           # [TB, D] f32

        # Fused first stage of both heads: Linear(D, 2H) + ReLU.
        hid = jnp.maximum(
            jnp.dot(emb.astype(jnp.bfloat16), w1_ref[...],
                    preferred_element_type=jnp.float32)
            + b1_ref[...], 0.0)                                      # [TB, 2H]

        # Fused, lane-dense second stage: Linear(2H, 128) (block structure with
        # zero padding so task A occupies cols [0:Ca), task B cols [Ca:Ca+Cb)).
        slab = (jnp.dot(hid.astype(jnp.bfloat16), w2_ref[...],
                        preferred_element_type=jnp.float32)
                + b2_ref[...])                                       # [TB, 128]

        emb_ref[...] = emb.astype(emb_ref.dtype)
        slab_ref[...] = slab.astype(slab_ref.dtype)


def multitask_head(last_hidden_state, params):
    """Run the multi-task head Pallas kernel.

    last_hidden_state: [B, S, D] (any float dtype; streamed as bf16)
    params: dict with weights laid out as [in, out] and biases as [1, out].
    """
    B, S, D = last_hidden_state.shape
    H = params["wa1"].shape[1]
    Ca = params["wa2"].shape[1]
    Cb = params["wb2"].shape[1]
    twoH = 2 * H
    C_PAD = 128                     # lane-dense logits slab width
    assert Ca + Cb <= C_PAD, (
        f"fused logits slab requires Ca + Cb <= {C_PAD}, got {Ca}+{Cb}")
    # Note: if D is not a multiple of 128 the emb output uses masked partial
    # lane stores — correct, just slightly slower.

    # ---- pack / fuse head weights (matrices in bf16 for the MXU) ------------
    w1 = jnp.concatenate([params["wa1"], params["wb1"]], axis=1)     # [D, 2H]
    b1 = jnp.concatenate([params["ba1"], params["bb1"]], axis=1)     # [1, 2H]
    w2 = jnp.zeros((twoH, C_PAD), jnp.float32)
    w2 = w2.at[:H, :Ca].set(params["wa2"])
    w2 = w2.at[H:, Ca:Ca + Cb].set(params["wb2"])                    # [2H, 128]
    b2 = jnp.zeros((1, C_PAD), jnp.float32)
    b2 = b2.at[:, :Ca].set(params["ba2"])
    b2 = b2.at[:, Ca:Ca + Cb].set(params["bb2"])                     # [1, 128]

    ws_bf = params["ws"].astype(jnp.bfloat16)
    w1_bf = w1.astype(jnp.bfloat16)
    w2_bf = w2.astype(jnp.bfloat16)
    bs_f32 = params["bs"].astype(jnp.float32)
    b1_f32 = b1.astype(jnp.float32)
    b2_f32 = b2.astype(jnp.float32)

    # ---- tiling --------------------------------------------------------------
    # Batch tile: multiple of 8, and split into >=2 tiles when B permits so the
    # "parallel" axis feeds both TensorCores on v7x.  (A 256-row tile for big-B
    # v6e epilogues is possible but irrelevant at these sizes.)
    TB = min(128, max(8, _round_up(pl.cdiv(B, 2), 8)))
    B_pad = _round_up(B, TB)

    # Sequence chunk: size the bf16 input buffer off the chip's VMEM capacity
    # (~1/8 of VMEM per buffer -> 1/4 when double-buffered).
    vmem_cap = _vmem_capacity_bytes()
    ts_target_bytes = vmem_cap // 8
    ts_target = max(16, ts_target_bytes // max(1, TB * D * 2))
    if S <= ts_target:
        TS, S_pad = S, S
    else:
        TS = max(16, (ts_target // 16) * 16)     # bf16 packs 16 rows per vreg
        S_pad = _round_up(S, TS)

    h = last_hidden_state.astype(jnp.bfloat16)
    if B_pad != B or S_pad != S:
        h = jnp.pad(h, ((0, B_pad - B), (0, S_pad - S), (0, 0)))

    grid = (B_pad // TB, S_pad // TS)
    inv_s = float(1.0 / S)          # divide by the true sequence length

    # ---- VMEM budget ---------------------------------------------------------
    h_bytes = 2 * TB * TS * D * 2                        # double-buffered bf16 input
    w_bytes = (D * D + D * twoH + twoH * C_PAD) * 2      # bf16, single-buffered
    b_bytes = (D + twoH + C_PAD) * 4                     # f32 biases
    o_bytes = 2 * (TB * D + TB * C_PAD) * 4              # double-buffered outputs
    s_bytes = TB * D * 4                                 # accumulator scratch
    need = h_bytes + w_bytes + b_bytes + o_bytes + s_bytes
    vmem_limit = int(min(0.85 * vmem_cap, max(32 * 2**20, 2 * need)))

    full_weight_bytes = 2 * (w_bytes + b_bytes)          # bf16 mats + f32 biases
    cost = pl.CostEstimate(
        flops=int(2 * B * (D * D + D * twoH + twoH * C_PAD) + B * S * D),
        transcendentals=int(B * D),
        bytes_accessed=int(B_pad * S_pad * D * 2          # streamed activations
                           + full_weight_bytes            # full resident weights
                           + 2 * B_pad * (D + C_PAD) * 4),  # both outputs
    )

    kernel = functools.partial(mtl_head_kernel, inv_s=inv_s)

    # Resident (constant-index) operands: single-buffered to save VMEM.
    def _const_spec(shape):
        return pl.BlockSpec(shape, lambda b, s: (0, 0),
                            pipeline_mode=pl.Buffered(1))

    emb, slab = pl.pallas_call(
        kernel,
        out_shape=(
            jax.ShapeDtypeStruct((B_pad, D), jnp.float32),      # embedding
            jax.ShapeDtypeStruct((B_pad, C_PAD), jnp.float32),  # fused logits slab
        ),
        grid_spec=pltpu.PrefetchScalarGridSpec(
            num_scalar_prefetch=0,
            grid=grid,
            in_specs=[
                pl.BlockSpec((TB, TS, D), lambda b, s: (b, s, 0)),  # h (streamed)
                _const_spec((D, D)),                                 # ws (bf16)
                _const_spec((1, D)),                                 # bs
                _const_spec((D, twoH)),                              # fused w1
                _const_spec((1, twoH)),                              # fused b1
                _const_spec((twoH, C_PAD)),                          # fused w2
                _const_spec((1, C_PAD)),                             # fused b2
            ],
            out_specs=[
                pl.BlockSpec((TB, D),     lambda b, s: (b, 0)),      # embedding
                pl.BlockSpec((TB, C_PAD), lambda b, s: (b, 0)),      # logits slab
            ],
            scratch_shapes=[pltpu.VMEM((TB, D), jnp.float32)],       # seq-sum acc
        ),
        compiler_params=pltpu.CompilerParams(
            dimension_semantics=("parallel", "arbitrary"),
            vmem_limit_bytes=vmem_limit,
        ),
        cost_estimate=cost,
    )(h, ws_bf, bs_f32, w1_bf, b1_f32, w2_bf, b2_f32)

    return {
        "embedding": emb[:B],
        "task_a_logits": slab[:B, :Ca],
        "task_b_logits": slab[:B, Ca:Ca + Cb],
    }


def reference_head(last_hidden_state, params):
    """Pure-JAX f32 reference matching the PyTorch module's forward."""
    pooled = jnp.mean(last_hidden_state.astype(jnp.float32), axis=1)
    emb = jnp.tanh(pooled @ params["ws"] + params["bs"])
    ha = jnp.maximum(emb @ params["wa1"] + params["ba1"], 0.0)
    la = ha @ params["wa2"] + params["ba2"]
    hb = jnp.maximum(emb @ params["wb1"] + params["bb1"], 0.0)
    lb = hb @ params["wb2"] + params["bb2"]
    return {"embedding": emb, "task_a_logits": la, "task_b_logits": lb}


def init_params(key, embedding_dim, hidden=128, num_classes_a=3, num_classes_b=3):
    """Deterministic synthetic parameter init (weights stored as [in, out])."""
    ks = jax.random.split(key, 10)
    scale = 0.02

    def w(k, shape):
        return (scale * jax.random.normal(k, shape)).astype(jnp.float32)

    D, H = embedding_dim, hidden
    return {
        "ws":  w(ks[0], (D, D)),
        "bs":  w(ks[1], (1, D)),
        "wa1": w(ks[2], (D, H)),
        "ba1": w(ks[3], (1, H)),
        "wa2": w(ks[4], (H, num_classes_a)),
        "ba2": w(ks[5], (1, num_classes_a)),
        "wb1": w(ks[6], (D, H)),
        "bb1": w(ks[7], (1, H)),
        "wb2": w(ks[8], (H, num_classes_b)),
        "bb2": w(ks[9], (1, num_classes_b)),
    }


def synthetic_backbone(input_ids, attention_mask, embed_table):
    """Plain-JAX stand-in for the HuggingFace transformer backbone."""
    h = embed_table[input_ids]                               # [B, S, D]
    h = h * attention_mask[..., None].astype(h.dtype)        # use the mask
    return h


if __name__ == "__main__":
    B, S, D = 2, 8, 32          # small shapes: batch=2, seq=8, embedding_dim=32
    VOCAB = 100

    key = jax.random.PRNGKey(0)
    k_ids, k_emb, k_params = jax.random.split(key, 3)

    input_ids = jax.random.randint(k_ids, (B, S), 0, VOCAB, dtype=jnp.int32)
    attention_mask = jnp.ones((B, S), dtype=jnp.float32)
    embed_table = (0.1 * jax.random.normal(k_emb, (VOCAB, D))).astype(jnp.float32)

    params = init_params(k_params, embedding_dim=D)

    last_hidden_state = synthetic_backbone(input_ids, attention_mask, embed_table)
    out = multitask_head(last_hidden_state, params)
    jax.block_until_ready(out)

    assert out["embedding"].shape == (B, D)
    assert out["task_a_logits"].shape == (B, 3)
    assert out["task_b_logits"].shape == (B, 3)

    # Tolerance check against the pure-JAX f32 reference (bf16 stream/weights).
    ref = reference_head(last_hidden_state, params)
    for name in ("embedding", "task_a_logits", "task_b_logits"):
        err = float(jnp.max(jnp.abs(out[name] - ref[name])))
        assert err < 1e-2, f"{name} max abs error {err} too large"

    print("KERNEL_OK")
</pallas_src>

<mosaic_0001>
module attributes {stable_mosaic.version = 11 : i64} {
  func.func @mtl_head_kernel(%arg0: i32, %arg1: i32, %arg2: memref<8x8x32xbf16, #tpu.memory_space<vmem>>, %arg3: memref<32x32xbf16, #tpu.memory_space<vmem>>, %arg4: memref<1x32xf32, #tpu.memory_space<vmem>>, %arg5: memref<32x256xbf16, #tpu.memory_space<vmem>>, %arg6: memref<1x256xf32, #tpu.memory_space<vmem>>, %arg7: memref<256x128xbf16, #tpu.memory_space<vmem>>, %arg8: memref<1x128xf32, #tpu.memory_space<vmem>>, %arg9: memref<8x32xf32, #tpu.memory_space<vmem>>, %arg10: memref<8x128xf32, #tpu.memory_space<vmem>>, %arg11: memref<8x32xf32, #tpu.memory_space<vmem>>) attributes {dimension_semantics = [#tpu.dimension_semantics<parallel>, #tpu.dimension_semantics<arbitrary>], iteration_bounds = array<i64: 1, 1>, scalar_prefetch = 0 : i64, scratch_operands = 1 : i64, tpu.core_type = #tpu.core_type<tc>, window_params = [{transform_indices = @transform_0, window_bounds = array<i64: 8, 8, 32>}, {pipeline_mode = #tpu.pipeline_mode<synchronous>, transform_indices = @transform_1, window_bounds = array<i64: 32, 32>}, {pipeline_mode = #tpu.pipeline_mode<synchronous>, transform_indices = @transform_2, window_bounds = array<i64: 1, 32>}, {pipeline_mode = #tpu.pipeline_mode<synchronous>, transform_indices = @transform_3, window_bounds = array<i64: 32, 256>}, {pipeline_mode = #tpu.pipeline_mode<synchronous>, transform_indices = @transform_4, window_bounds = array<i64: 1, 256>}, {pipeline_mode = #tpu.pipeline_mode<synchronous>, transform_indices = @transform_5, window_bounds = array<i64: 256, 128>}, {pipeline_mode = #tpu.pipeline_mode<synchronous>, transform_indices = @transform_6, window_bounds = array<i64: 1, 128>}, {transform_indices = @transform_7, window_bounds = array<i64: 8, 32>}, {transform_indices = @transform_8, window_bounds = array<i64: 8, 128>}]} {
    %c0_i32 = arith.constant 0 : i32
    %0 = arith.cmpi eq, %arg1, %c0_i32 : i32
    %1 = arith.extui %0 : i1 to i32
    %c0_i32_0 = arith.constant 0 : i32
    %2 = arith.cmpi ne, %1, %c0_i32_0 : i32
    scf.if %2 {
      %cst_9 = arith.constant 0.000000e+00 : f32
      %12 = vector.broadcast %cst_9 : f32 to vector<8x32xf32>
      %c0_10 = arith.constant 0 : index
      %c0_11 = arith.constant 0 : index
      %13 = vector.load %arg11[%c0_10, %c0_11] : memref<8x32xf32, #tpu.memory_space<vmem>>, vector<8x32xf32>
      tpu.vector_store %arg11[%c0_10, %c0_11], %12 {strides = array<i32>} : memref<8x32xf32, #tpu.memory_space<vmem>>, vector<8x32xf32>,
    } else {
    }
    %c0 = arith.constant 0 : index
    %c0_1 = arith.constant 0 : index
    %3 = vector.load %arg11[%c0, %c0_1] : memref<8x32xf32, #tpu.memory_space<vmem>>, vector<8x32xf32>
    %c0_2 = arith.constant 0 : index
    %c0_3 = arith.constant 0 : index
    %c0_4 = arith.constant 0 : index
    %4 = vector.load %arg2[%c0_2, %c0_3, %c0_4] : memref<8x8x32xbf16, #tpu.memory_space<vmem>>, vector<8x8x32xbf16>
    %5 = arith.extf %4 : vector<8x8x32xbf16> to vector<8x8x32xf32>
    %cst = arith.constant dense<0.000000e+00> : vector<8x32xf32>
    %6 = vector.multi_reduction <add>, %5, %cst [1] : vector<8x8x32xf32> to vector<8x32xf32>
    %7 = arith.addf %3, %6 : vector<8x32xf32>
    %c0_5 = arith.constant 0 : index
    %c0_6 = arith.constant 0 : index
    %8 = vector.load %arg11[%c0_5, %c0_6] : memref<8x32xf32, #tpu.memory_space<vmem>>, vector<8x32xf32>
    tpu.vector_store %arg11[%c0_5, %c0_6], %7 {strides = array<i32>} : memref<8x32xf32, #tpu.memory_space<vmem>>, vector<8x32xf32>,
    %c0_i32_7 = arith.constant 0 : i32
    %9 = arith.cmpi eq, %arg1, %c0_i32_7 : i32
    %10 = arith.extui %9 : i1 to i32
    %c0_i32_8 = arith.constant 0 : i32
    %11 = arith.cmpi ne, %10, %c0_i32_8 : i32
    scf.if %11 {
      %c0_9 = arith.constant 0 : index
      %c0_10 = arith.constant 0 : index
      %12 = vector.load %arg11[%c0_9, %c0_10] : memref<8x32xf32, #tpu.memory_space<vmem>>, vector<8x32xf32>
      %cst_11 = arith.constant 1.250000e-01 : f32
      %13 = vector.broadcast %cst_11 : f32 to vector<8x32xf32>
      %14 = arith.mulf %12, %13 : vector<8x32xf32>
      %15 = arith.truncf %14 : vector<8x32xf32> to vector<8x32xbf16>
      %c0_12 = arith.constant 0 : index
      %c0_13 = arith.constant 0 : index
      %16 = vector.load %arg3[%c0_12, %c0_13] : memref<32x32xbf16, #tpu.memory_space<vmem>>, vector<32x32xbf16>
      %cst_14 = arith.constant dense<0.000000e+00> : vector<8x32xf32>
      %17 = tpu.matmul %15, %16, %cst_14 {dimension_numbers = #tpu.dot_dimension_numbers<[1], [0], [0], [1], [0, 0, 1, 1], [], []>} : vector<8x32xbf16>, vector<32x32xbf16>, vector<8x32xf32> -> vector<8x32xf32>
      %c0_15 = arith.constant 0 : index
      %c0_16 = arith.constant 0 : index
      %18 = vector.load %arg4[%c0_15, %c0_16] : memref<1x32xf32, #tpu.memory_space<vmem>>, vector<1x32xf32>
      %19 = vector.broadcast %18 : vector<1x32xf32> to vector<8x32xf32>
      %20 = arith.addf %17, %19 : vector<8x32xf32>
      %21 = math.tanh %20 : vector<8x32xf32>
      %22 = arith.truncf %21 : vector<8x32xf32> to vector<8x32xbf16>
      %c0_17 = arith.constant 0 : index
      %c0_18 = arith.constant 0 : index
      %23 = vector.load %arg5[%c0_17, %c0_18] : memref<32x256xbf16, #tpu.memory_space<vmem>>, vector<32x256xbf16>
      %cst_19 = arith.constant dense<0.000000e+00> : vector<8x256xf32>
      %24 = tpu.matmul %22, %23, %cst_19 {dimension_numbers = #tpu.dot_dimension_numbers<[1], [0], [0], [1], [0, 0, 1, 1], [], []>} : vector<8x32xbf16>, vector<32x256xbf16>, vector<8x256xf32> -> vector<8x256xf32>
      %c0_20 = arith.constant 0 : index
      %c0_21 = arith.constant 0 : index
      %25 = vector.load %arg6[%c0_20, %c0_21] : memref<1x256xf32, #tpu.memory_space<vmem>>, vector<1x256xf32>
      %26 = vector.broadcast %25 : vector<1x256xf32> to vector<8x256xf32>
      %27 = arith.addf %24, %26 : vector<8x256xf32>
      %cst_22 = arith.constant 0.000000e+00 : f32
      %28 = vector.broadcast %cst_22 : f32 to vector<8x256xf32>
      %29 = arith.maximumf %27, %28 : vector<8x256xf32>
      %30 = arith.truncf %29 : vector<8x256xf32> to vector<8x256xbf16>
      %c0_23 = arith.constant 0 : index
      %c0_24 = arith.constant 0 : index
      %31 = vector.load %arg7[%c0_23, %c0_24] : memref<256x128xbf16, #tpu.memory_space<vmem>>, vector<256x128xbf16>
      %cst_25 = arith.constant dense<0.000000e+00> : vector<8x128xf32>
      %32 = tpu.matmul %30, %31, %cst_25 {dimension_numbers = #tpu.dot_dimension_numbers<[1], [0], [0], [1], [0, 0, 1, 1], [], []>} : vector<8x256xbf16>, vector<256x128xbf16>, vector<8x128xf32> -> vector<8x128xf32>
      %c0_26 = arith.constant 0 : index
      %c0_27 = arith.constant 0 : index
      %33 = vector.load %arg8[%c0_26, %c0_27] : memref<1x128xf32, #tpu.memory_space<vmem>>, vector<1x128xf32>
      %34 = vector.broadcast %33 : vector<1x128xf32> to vector<8x128xf32>
      %35 = arith.addf %32, %34 : vector<8x128xf32>
      %c0_28 = arith.constant 0 : index
      %c0_29 = arith.constant 0 : index
      %36 = vector.load %arg9[%c0_28, %c0_29] : memref<8x32xf32, #tpu.memory_space<vmem>>, vector<8x32xf32>
      tpu.vector_store %arg9[%c0_28, %c0_29], %21 {strides = array<i32>} : memref<8x32xf32, #tpu.memory_space<vmem>>, vector<8x32xf32>,
      %c0_30 = arith.constant 0 : index
      %c0_31 = arith.constant 0 : index
      %37 = vector.load %arg10[%c0_30, %c0_31] : memref<8x128xf32, #tpu.memory_space<vmem>>, vector<8x128xf32>
      tpu.vector_store %arg10[%c0_30, %c0_31], %35 {strides = array<i32>} : memref<8x128xf32, #tpu.memory_space<vmem>>, vector<8x128xf32>,
    } else {
    }
    return
  }
  func.func @transform_0(%arg0: i32, %arg1: i32) -> (i32, i32, i32) {
    %c0_i32 = arith.constant 0 : i32
    %c0_i32_0 = arith.constant 0 : i32
    return %arg0, %arg1, %c0_i32 : i32, i32, i32
  }
  func.func @transform_1(%arg0: i32, %arg1: i32) -> (i32, i32) {
    %c0_i32 = arith.constant 0 : i32
    %c0_i32_0 = arith.constant 0 : i32
    %c0_i32_1 = arith.constant 0 : i32
    return %c0_i32, %c0_i32_0 : i32, i32
  }
  func.func @transform_2(%arg0: i32, %arg1: i32) -> (i32, i32) {
    %c0_i32 = arith.constant 0 : i32
    %c0_i32_0 = arith.constant 0 : i32
    %c0_i32_1 = arith.constant 0 : i32
    return %c0_i32, %c0_i32_0 : i32, i32
  }
  func.func @transform_3(%arg0: i32, %arg1: i32) -> (i32, i32) {
    %c0_i32 = arith.constant 0 : i32
    %c0_i32_0 = arith.constant 0 : i32
    %c0_i32_1 = arith.constant 0 : i32
    return %c0_i32, %c0_i32_0 : i32, i32
  }
  func.func @transform_4(%arg0: i32, %arg1: i32) -> (i32, i32) {
    %c0_i32 = arith.constant 0 : i32
    %c0_i32_0 = arith.constant 0 : i32
    %c0_i32_1 = arith.constant 0 : i32
    return %c0_i32, %c0_i32_0 : i32, i32
  }
  func.func @transform_5(%arg0: i32, %arg1: i32) -> (i32, i32) {
    %c0_i32 = arith.constant 0 : i32
    %c0_i32_0 = arith.constant 0 : i32
    %c0_i32_1 = arith.constant 0 : i32
    return %c0_i32, %c0_i32_0 : i32, i32
  }
  func.func @transform_6(%arg0: i32, %arg1: i32) -> (i32, i32) {
    %c0_i32 = arith.constant 0 : i32
    %c0_i32_0 = arith.constant 0 : i32
    %c0_i32_1 = arith.constant 0 : i32
    return %c0_i32, %c0_i32_0 : i32, i32
  }
  func.func @transform_7(%arg0: i32, %arg1: i32) -> (i32, i32) {
    %c0_i32 = arith.constant 0 : i32
    %c0_i32_0 = arith.constant 0 : i32
    return %arg0, %c0_i32 : i32, i32
  }
  func.func @transform_8(%arg0: i32, %arg1: i32) -> (i32, i32) {
    %c0_i32 = arith.constant 0 : i32
    %c0_i32_0 = arith.constant 0 : i32
    return %arg0, %c0_i32 : i32, i32
  }
}

</mosaic_0001>

<bundles_post_ra>
// kernel: tpu_custom_call.1
= control target key start
LH: loop header
LB: loop body
LE: loop exit
PB: predicated region body
PF: predicated region fallthrough
CT: control target
= control target key end

     0   :  { %14 = vsyncpa [#allocation4], 0  ;;  %s918_s0 = inlined_call_operand.hbm [shape: bf16[8,8,32], index: 0, kind: input, shape index: {}]   ;;  %s919_s1 = inlined_call_operand.hbm [shape: bf16[32,32], index: 1, kind: input, shape index: {}]   ;;  %s920_s2 = inlined_call_operand.vmem [shape: f32[1,32], index: 2, kind: input, shape index: {}]   ;;  %s921_s3 = inlined_call_operand.hbm [shape: bf16[32,256], index: 3, kind: input, shape index: {}]   ;;  %s922_s4 = inlined_call_operand.vmem [shape: f32[1,256], index: 4, kind: input, shape index: {}]   ;;  %s923_s5 = inlined_call_operand.hbm [shape: bf16[256,128], index: 5, kind: input, shape index: {}]   ;;  %s924_s6 = inlined_call_operand.vmem [shape: f32[1,128], index: 6, kind: input, shape index: {}]   ;;  %s925_s7 = inlined_call_operand.hbm [shape: f32[8,32], index: 7, kind: output, shape index: {0}]   ;;  %s926_s8 = inlined_call_operand.hbm [shape: f32[8,128], index: 8, kind: output, shape index: {1}]  }
   0x1   :  { %15 = vsyncpa [#allocation7], 0 }
   0x2   :  { %16 = vsyncpa [#allocation10], 0 }
   0x3   :  { %17 = vsyncpa [#allocation5], 0 }
   0x4   :  { %18 = vsyncpa [#allocation13], 0  ;;  %s804_s27 = smov [#allocation6]   ;;  %s805_s29 = smov [#allocation3]  }
   0x5   :  { %s36_s28 = sshll.u32 %s804_s27, 4  ;;  %s24_s30 = sshll.u32 %s805_s29, 4  ;;  %s37_s28 = int_to_ptr.vmem [resolvable:$true] %s36_s28  ;;  %s25_s30 = int_to_ptr.vmem [resolvable:$true] %s24_s30 }
   0x6   :  { %s682_s9 = scalar_lea.vmem %s37_s28, 256  ;;  %p687_p1 = scmp.lt.s32.totalorder %s37_s28, %s37_s28 }
   0x7   :  { %p683_p0 = scmp.ne.s32.totalorder %s37_s28, %s682_s9  ;;  %p688_p2 = scmp.lt.s32.totalorder %s682_s9, %s682_s9 }
   0x9   :  { %p689_p3 = por %p688_p2, %p687_p1 }
   0xb   :  { %p690_p4 = pnand %p689_p3, %p683_p0 }
   0xd   :  { %693 = shalt.err (!%p690_p4)
}
   0xe   :  { %s806_s10 = smov 64   ;;  %s807_s11 = smov 4  }
   0xf   :  { %42 = dma.hbm_to_vmem [thread:$0]  %s919_s1, 256, %s37_s28, [#allocation7], %s806_s10, %s806_s10, %s807_s11  }
  0x10   :  { %s702_s14 = scalar_lea.vmem %s25_s30, 512  ;;  %p707_p6 = scmp.lt.s32.totalorder %s25_s30, %s25_s30 }
  0x11   :  { %p703_p5 = scmp.ne.s32.totalorder %s25_s30, %s702_s14  ;;  %p708_p7 = scmp.lt.s32.totalorder %s702_s14, %s702_s14 }
  0x13   :  { %p709_p8 = por %p708_p7, %p707_p6 }
  0x15   :  { %p710_p9 = pnand %p709_p8, %p703_p5 }
  0x17   :  { %713 = shalt.err (!%p710_p9)
}
  0x18   :  { %30 = dma.hbm_to_vmem [thread:$0]  %s918_s0, 512, %s25_s30, [#allocation4], %s806_s10, %s806_s10, %s807_s11  }
  0x19   :  { %s808_s17 = smov [#allocation8]  }
  0x1a   :  { %s50_s18 = sshll.u32 %s808_s17, 4  ;;  %s51_s18 = int_to_ptr.vmem [resolvable:$true] %s50_s18 }
  0x1b   :  { %s722_s19 = scalar_lea.vmem %s51_s18, 512  ;;  %p727_p11 = scmp.lt.s32.totalorder %s51_s18, %s51_s18 }
  0x1c   :  { %p723_p10 = scmp.ne.s32.totalorder %s51_s18, %s722_s19  ;;  %p728_p12 = scmp.lt.s32.totalorder %s722_s19, %s722_s19 }
  0x1e   :  { %p729_p13 = por %p728_p12, %p727_p11 }
  0x20   :  { %p730_p0 = pnand %p729_p13, %p723_p10 }
  0x22   :  { %733 = shalt.err (!%p730_p0)
}
  0x23   :  { %s809_s1 = smov 128   ;;  %s810_s20 = smov 8  }
  0x24   :  { %56 = dma.hbm_to_vmem [thread:$0]  %s921_s3, 512, %s51_s18, [#allocation7], %s809_s1, %s809_s1, %s810_s20  }
  0x25   :  { %s811_s23 = smov [#allocation9]  }
  0x26   :  { %s64_s24 = sshll.u32 %s811_s23, 4  ;;  %s65_s24 = int_to_ptr.vmem [resolvable:$true] %s64_s24 }
  0x27   :  { %s742_s0 = scalar_lea.vmem %s65_s24, 2048  ;;  %p747_p2 = scmp.lt.s32.totalorder %s65_s24, %s65_s24 }
  0x28   :  { %p743_p1 = scmp.ne.s32.totalorder %s65_s24, %s742_s0  ;;  %p748_p3 = scmp.lt.s32.totalorder %s742_s0, %s742_s0 }
  0x2a   :  { %p749_p4 = por %p748_p3, %p747_p2 }
  0x2c   :  { %p750_p5 = pnand %p749_p4, %p743_p1 }
  0x2e   :  { %753 = shalt.err (!%p750_p5)
}
  0x2f   :  { %70 = dma.hbm_to_vmem [thread:$0]  %s923_s5, 2048, %s65_s24, [#allocation10], %s806_s10, %s806_s10, %s807_s11  }
  0x30   :  { %794 = dma.done.wait [#allocation4], 512  }
  0x31   :  { %795 = vsyncadd [#allocation4], 4294966784 }
  0x32   :  { %796 = dma.done.wait [#allocation7], 768  }
  0x33   :  { %797 = vsyncadd [#allocation7], 4294966528 }
  0x34   :  { %798 = dma.done.wait [#allocation10], 2048  }
  0x35   :  { %799 = vsyncadd [#allocation10], 4294965248  ;;  %vm90_vm0 = vcmask 261120   ;;  %v812_v0 = vmov 0.0   ;;  %vm813_vm1 = vmmov 0   ;;  %v584_v1 = vld [vmem:[#allocation3] sm:$0xff]  }
  0x36   :  { %91 = vst.msk [vmem:[#allocation2] sm:$0xff] %vm90_vm0, %v812_v0  ;;  %627 = vmatprep.subr.bf16.mxu1 %v812_v0  ;;  %631 = vmatprep.mubr.msk.bf16.mxu1 %vm813_vm1, %v812_v0  ;;  %v599_v2 = vld [vmem:[#allocation3 + $0x8] sm:$0xff]   ;;  %v600_v3 = vld [vmem:[#allocation3 + $0x10] sm:$0xff]   ;;  %v585_v4 = vunpack.c.l.bf16 %v584_v1  ;;  %v586_v5 = vunpack.c.h.bf16 %v584_v1  ;;  %v601_v8 = vld [vmem:[#allocation3 + $0x18] sm:$0xff]   ;;  %vm174_vm2 = vcmask 1041409   ;;  %vm176_vm3 = vcmask 1042434  }
  0x37   :  { %v589_v6 = vunpack.c.l.bf16 %v599_v2  ;;  %v590_v7 = vunpack.c.h.bf16 %v599_v2  ;;  %v593_v9 = vunpack.c.l.bf16 %v600_v3  ;;  %v594_v10 = vunpack.c.h.bf16 %v600_v3  ;;  %v648_v13 = vld [vmem:[#allocation6 + $0x8] sm:$0xff]   ;;  %v649_v22 = vld [vmem:[#allocation6] sm:$0xff]   ;;  %s815_s28 = smov [#allocation11]  }
  0x38   :  { %v597_v11 = vunpack.c.l.bf16 %v601_v8  ;;  %v598_v12 = vunpack.c.h.bf16 %v601_v8  ;;  %v110_v14 = vsel %vm90_vm0, %v585_v4, 0.0  ;;  %v117_v15 = vsel %vm90_vm0, %v586_v5, 0.0  ;;  %628 = vmatpush3.bf16.msra.mxu1 %v648_v13  ;;  %s532_s29 = sshll.u32 %s815_s28, 4  ;;  %s533_s29 = int_to_ptr.vmem [resolvable:$true] %s532_s29 }
  0x39   :  { %v124_v16 = vsel %vm90_vm0, %v589_v6, 0.0  ;;  %v131_v17 = vsel %vm90_vm0, %v590_v7, 0.0  ;;  %v111_v18 = vrot.slane %v110_v14, 4  ;;  %v118_v19 = vrot.slane %v117_v15, 4  ;;  %629 = vmatprep.subr.bf16.mxu1 %v812_v0  ;;  %s754_s30 = scalar_lea.vmem %s533_s29, 128  ;;  %p759_p7 = scmp.lt.s32.totalorder %s533_s29, %s533_s29 }
  0x3a   :  { %v125_v20 = vrot.slane %v124_v16, 4  ;;  %v132_v21 = vrot.slane %v131_v17, 4  ;;  %v138_v23 = vsel %vm90_vm0, %v593_v9, 0.0  ;;  %v145_v24 = vsel %vm90_vm0, %v594_v10, 0.0  ;;  %p755_p6 = scmp.ne.s32.totalorder %s533_s29, %s754_s30  ;;  %p760_p8 = scmp.lt.s32.totalorder %s754_s30, %s754_s30 }
  0x3b   :  { %v152_v25 = vsel %vm90_vm0, %v597_v11, 0.0  ;;  %v159_v26 = vsel %vm90_vm0, %v598_v12, 0.0  ;;  %v112_v27 = vadd.f32 %v111_v18, %v110_v14  ;;  %v119_v28 = vadd.f32 %v118_v19, %v117_v15  ;;  %v652_v19 = vld [vmem:[#allocation8 + $0x14] ss:$8 sps:$4 sm:$0xff]  }
  0x3c   :  { %v126_v29 = vadd.f32 %v125_v20, %v124_v16  ;;  %v133_v30 = vadd.f32 %v132_v21, %v131_v17  ;;  %v139_v31 = vrot.slane %v138_v23, 4  ;;  %v146_v32 = vrot.slane %v145_v24, 4  ;;  %630 = vmatpush3.bf16.msra.mxu1 %v649_v22  ;;  %v650_v20 = vld [vmem:[#allocation8 + $0x10] ss:$8 sps:$4 sm:$0xff]   ;;  %v655_v21 = vld [vmem:[#allocation8 + $0x4] ss:$8 sps:$4 sm:$0xff]   ;;  %p761_p9 = por %p760_p8, %p759_p7 }
  0x3d   :  { %v153_v33 = vrot.slane %v152_v25, 4  ;;  %v160_v34 = vrot.slane %v159_v26, 4  ;;  %v113_v35 = vrot.slane %v112_v27, 2  ;;  %v120_v36 = vrot.slane %v119_v28, 2  ;;  %v92_v11 = vld [vmem:[#allocation2] sm:$0xff]  ;;  %316 = vmatprep.subr.bf16.mxu1 %v652_v19 }
  0x3e   :  { %v127_v37 = vrot.slane %v126_v29, 2  ;;  %v134_v38 = vrot.slane %v133_v30, 2  ;;  %vm178_vm4 = vcmask 1043459   ;;  %v140_v39 = vadd.f32 %v139_v31, %v138_v23  ;;  %v653_v22 = vld [vmem:[#allocation8] ss:$8 sps:$4 sm:$0xff]   ;;  %p762_p10 = pnand %p761_p9, %p755_p6 }
  0x3f   :  { %v147_v40 = vadd.f32 %v146_v32, %v145_v24  ;;  %v154_v41 = vadd.f32 %v153_v33, %v152_v25  ;;  %v161_v42 = vadd.f32 %v160_v34, %v159_v26  ;;  %vm180_vm5 = vcmask 1044484   ;;  %v656_v24 = vld [vmem:[#allocation9 + $0x78] sm:$0xff]   ;;  %v658_v26 = vld [vmem:[#allocation9 + $0x70] sm:$0xff]   ;;  %v663_v31 = vld [vmem:[#allocation9 + $0x20] sm:$0xff]  }
  0x40   :  { %v114_v43 = vadd.f32 %v113_v35, %v112_v27  ;;  %v121_v44 = vadd.f32 %v120_v36, %v119_v28  ;;  %v128_v45 = vadd.f32 %v127_v37, %v126_v29  ;;  %v135_v46 = vadd.f32 %v134_v38, %v133_v30  ;;  %v657_v25 = vld [vmem:[#allocation9 + $0x38] sm:$0xff]   ;;  %605 = vmatprep.subr.bf16.mxu0 %v656_v24  ;;  %v659_v27 = vld [vmem:[#allocation9 + $0x30] sm:$0xff]   ;;  %v660_v28 = vld [vmem:[#allocation9 + $0x68] sm:$0xff]  }
  0x41   :  { %vm182_vm6 = vcmask 1045509   ;;  %v141_v47 = vrot.slane %v140_v39, 2  ;;  %v148_v48 = vrot.slane %v147_v40, 2  ;;  %v155_v49 = vrot.slane %v154_v41, 2  ;;  %606 = vmatpush3.bf16.msra.mxu0 %v657_v25  ;;  %v661_v29 = vld [vmem:[#allocation9 + $0x28] sm:$0xff]   ;;  %v662_v30 = vld [vmem:[#allocation9 + $0x60] sm:$0xff]  }
  0x42   :  { %v162_v50 = vrot.slane %v161_v42, 2  ;;  %vm184_vm7 = vcmask 1046534   ;;  %v115_v51 = vrot.slane %v114_v43, 1  ;;  %v122_v52 = vrot.slane %v121_v44, 1  ;;  %607 = vmatprep.subr.bf16.mxu0 %v658_v26  ;;  %v664_v32 = vld [vmem:[#allocation9 + $0x58] sm:$0xff]   ;;  %v666_v34 = vld [vmem:[#allocation9 + $0x50] sm:$0xff]  }
  0x43   :  { %v129_v53 = vrot.slane %v128_v45, 1  ;;  %v136_v54 = vrot.slane %v135_v46, 1  ;;  %vm186_vm8 = vcmask 1047559   ;;  %v142_v55 = vadd.f32 %v141_v47, %v140_v39  ;;  %v665_v33 = vld [vmem:[#allocation9 + $0x18] sm:$0xff]   ;;  %v667_v35 = vld [vmem:[#allocation9 + $0x10] sm:$0xff]   ;;  %v671_v47 = vld [vmem:[#allocation9] sm:$0xff]  }
  0x44   :  { %v149_v56 = vadd.f32 %v148_v48, %v147_v40  ;;  %v156_v57 = vadd.f32 %v155_v49, %v154_v41  ;;  %v163_v58 = vadd.f32 %v162_v50, %v161_v42  ;;  %v116_v59 = vadd.f32 %v115_v51, %v114_v43  ;;  %v557_v36 = vld [vmem:[%s920_s2] ss:$0 sm:$0xff] }
  0x45   :  { %v123_v60 = vadd.f32 %v122_v52, %v121_v44  ;;  %v130_v61 = vadd.f32 %v129_v53, %v128_v45  ;;  %v137_v62 = vadd.f32 %v136_v54, %v135_v46  ;;  %v143_v63 = vrot.slane %v142_v55, 1  ;;  %608 = vmatpush3.bf16.msra.mxu0 %v659_v27  ;;  %v668_v44 = vld [vmem:[#allocation9 + $0x48] sm:$0xff]   ;;  %v670_v46 = vld [vmem:[#allocation9 + $0x40] sm:$0xff]  }
  0x46   :  { %v150_v0 = vrot.slane %v149_v56, 1  ;;  %v157_v1 = vrot.slane %v156_v57, 1  ;;  %v164_v2 = vrot.slane %v163_v58, 1  ;;  %v814_v23 = vmov 0   ;;  %609 = vmatprep.subr.bf16.mxu0 %v660_v28  ;;  %v669_v45 = vld [vmem:[#allocation9 + $0x8] sm:$0xff]  }
  0x47   :  { %v175_v3 = vsel %vm174_vm2, %v123_v60, %v116_v59  ;;  %v144_v4 = vadd.f32 %v143_v63, %v142_v55  ;;  %v271_v48 = vlaneseq  ;;  %v269_v51 = vld [vmem:[%s922_s4] sm:$0x3] }
  0x48   :  { %v151_v5 = vadd.f32 %v150_v0, %v149_v56  ;;  %v158_v6 = vadd.f32 %v157_v1, %v156_v57  ;;  %v177_v7 = vsel %vm176_vm3, %v130_v61, %v175_v3  ;;  %v165_v8 = vadd.f32 %v164_v2, %v163_v58 }
  0x49   :  { %v179_v9 = vsel %vm178_vm4, %v137_v62, %v177_v7  ;;  %610 = vmatpush3.bf16.msra.mxu0 %v661_v29  ;;  %v272_v49 = vshrl.u32 %v271_v48, 7 }
  0x4a   :  { %v181_v10 = vsel %vm180_vm5, %v144_v4, %v179_v9  ;;  %611 = vmatprep.subr.bf16.mxu0 %v662_v30 }
  0x4b   :  { %v183_v12 = vsel %vm182_vm6, %v151_v5, %v181_v10  ;;  %v273_v50 = vsub.s32 0, %v272_v49  ;;  %v277_v52 = vsub.s32 1, %v272_v49 }
  0x4c   :  { %v185_v13 = vsel %vm184_vm7, %v158_v6, %v183_v12 }
  0x4d   :  { %v187_v14 = vsel %vm186_vm8, %v165_v8, %v185_v13  ;;  %612 = vmatpush3.bf16.msra.mxu0 %v663_v31  ;;  %v274_v53 = vrot.slane %v269_v51, %v273_v50  ;;  %v278_v54 = vrot.slane %v269_v51, %v277_v52 }
  0x4e   :  { %v189_v15 = vadd.f32 %v187_v14, %v92_v11  ;;  %613 = vmatprep.subr.bf16.mxu0 %v664_v32 }
  0x50   :  { %190 = vst.msk [vmem:[#allocation2] sm:$0xff] %vm90_vm0, %v189_v15 }
  0x51   :  { %614 = vmatpush3.bf16.msra.mxu0 %v665_v33 }
  0x52   :  { %615 = vmatprep.subr.bf16.mxu0 %v666_v34 }
  0x55   :  { %616 = vmatpush3.bf16.msra.mxu0 %v667_v35 }
  0x56   :  { %617 = vmatprep.subr.bf16.mxu0 %v668_v44 }
  0x57   :  { %v194_v16 = vld [vmem:[#allocation2] sm:$0xff] }
  0x58   :  { %v195_v17 = vmul.f32 0.125, %v194_v16 }
  0x59   :  { %618 = vmatpush3.bf16.msra.mxu0 %v669_v45 }
  0x5a   :  { %v196_v18 = vpack.c.bf16 %v195_v17, %v195_v17  ;;  %619 = vmatprep.subr.bf16.mxu0 %v670_v46 }
  0x5c   :  { %632 = vmatmul.mubr.msk.bf16.vlgmr.msra.gmra.mxu1 %vm90_vm0, %v196_v18 }
  0x5d   :  { %317 = vmatpush1.bf16.msra.mxu1 %v650_v20  ;;  %336 = vmatprep.mubr.bf16.mxu1 %v814_v23 }
  0x5e   :  { %318 = vmatprep.subr.bf16.mxu1 %v655_v21  ;;  %620 = vmatpush3.bf16.msra.mxu0 %v671_v47 }
  0x61   :  { %319 = vmatpush1.bf16.msra.mxu1 %v653_v22 }
 0x11c   :  { %v257_v37 = vpop.f32.mrf.mxu1 }
 0x11d   :  { %v258_v38 = vadd.f32 %v557_v36, %v257_v37 }
 0x11e   :  { %v633_v39 = vpop.f32.mrf.mxu1 }
 0x11f   :  { %672 = vtanh.f32 %v258_v38 }
 0x120   :  { %v260_v40 = vpop.f32.mrf.mxu1 }
 0x122   :  { %v634_v41 = vpop.f32.mrf.mxu1 }
 0x12c   :  { %v673_v42 = vpop.eup %672 }
 0x12d   :  { %524 = vst.msk [vmem:[#allocation11] sm:$0xff] %vm90_vm0, %v673_v42  ;;  %v264_v43 = vpack.c.bf16 %v673_v42, %v673_v42 }
 0x12f   :  { %565 = vmatmul.mubr.msk.bf16.vlgmr.msra.gmra.mxu1 %vm90_vm0, %v264_v43 }
 0x1ef   :  { %v338_v55 = vpop.f32.mrf.mxu1 }
 0x1f0   :  { %v339_v56 = vadd.f32 %v338_v55, %v274_v53 }
 0x1f1   :  { %v340_v57 = vpop.f32.mrf.mxu1 }
 0x1f2   :  { %v341_v58 = vadd.f32 %v340_v57, %v278_v54  ;;  %v345_v59 = vmax.f32 %v339_v56, 0.0 }
 0x1f3   :  { %v342_v60 = vpop.f32.mrf.mxu1 }
 0x1f4   :  { %v346_v61 = vmax.f32 %v341_v58, 0.0  ;;  %v347_v0 = vpack.c.bf16 %v345_v59, %v345_v59 }
 0x1f5   :  { %v343_v62 = vpop.f32.mrf.mxu1 }
 0x1f6   :  { %v348_v63 = vpack.c.bf16 %v346_v61, %v346_v61 }
 0x1f8   :  { %516 = vmatprep.mubr.bf16.mxu0 %v348_v63 }
 0x1f9   :  { %517 = vmatmul.mubr.bf16.vlgmr.msra.gmra.mxu0 %v347_v0 }
 0x1fa   :  { %765 = shalt.err (!%p762_p10)
}
 0x1fb   :  { %535 = dma.vmem_to_hbm [thread:$0]  %s533_s29, 128, %s925_s7, [#allocation5]   ;;  %v566_v2 = vld [vmem:[%s924_s6] ss:$0 sm:$0xff] }
 0x1fc   :  { %s816_s12 = smov [#allocation12]  }
 0x1fd   :  { %s542_s13 = sshll.u32 %s816_s12, 4  ;;  %s543_s13 = int_to_ptr.vmem [resolvable:$true] %s542_s13 }
 0x1fe   :  { %s774_s14 = scalar_lea.vmem %s543_s13, 128  ;;  %p779_p12 = scmp.lt.s32.totalorder %s543_s13, %s543_s13 }
 0x1ff   :  { %p775_p11 = scmp.ne.s32.totalorder %s543_s13, %s774_s14  ;;  %p780_p13 = scmp.lt.s32.totalorder %s774_s14, %s774_s14 }
 0x201   :  { %p781_p0 = por %p780_p13, %p779_p12 }
 0x203   :  { %p782_p1 = pnand %p781_p0, %p775_p11 }
 0x2b9   :  { %v621_v1 = vpop.f32.mrf.mxu0 }
 0x2bb   :  { %v622_v3 = vpop.f32.mrf.mxu0 }
 0x2bc   :  { %v623_v4 = vadd.f32 %v622_v3, %v621_v1 }
 0x2bd   :  { %v624_v5 = vpop.f32.mrf.mxu0 }
 0x2be   :  { %v519_v6 = vadd.f32 %v623_v4, %v566_v2 }
 0x2bf   :  { %v625_v7 = vpop.f32.mrf.mxu0 }
 0x2c0   :  { %525 = vst [vmem:[#allocation12] sm:$0xff] %v519_v6 }
 0x2c1   :  { %785 = shalt.err (!%p782_p1)
}
 0x2c2   :  { %545 = dma.vmem_to_hbm [thread:$0]  %s543_s13, 128, %s926_s8, [#allocation13]  }
 0x2c3   :  { %800 = dma.done.wait [#allocation5], 128  }
 0x2c4   :  { %801 = vsyncadd [#allocation5], 4294967168 }
 0x2c5   :  { %802 = dma.done.wait [#allocation13], 128  }
 0x2c6   :  { %803 = vsyncadd [#allocation13], 4294967168 }
 0x2c7   :  { %552 = vsyncpa [#allocation4], 1 }
 0x2c8   :  { %553 = vsyncpa [#allocation7], 1 }
 0x2c9   :  { %554 = vsyncpa [#allocation10], 1 }
 0x2ca   :  { %555 = vsyncpa [#allocation5], 1 }
 0x2cb   :  { %556 = vsyncpa [#allocation13], 1 }

</bundles_post_ra>
